<compile_context>
chip_gen: v5e
topology: v5e:2x2
jax: 0.10.0
libtpu: 0.0.40
codegen_flags: <defaults>
</compile_context>

<pallas_src>
import functools

import jax
import jax.numpy as jnp
from jax.experimental import pallas as pl
from jax.experimental.pallas import tpu as pltpu


# ----------------------------------------------------------------------------
# Fused kernel: patch-embed + SDM + (view + avg-pool + fc) for one batch elem
# ----------------------------------------------------------------------------
def _chromaformer_kernel(x_ref, wpe_ref, bpe_ref, wqkv_ref, wpf_ref, fcb_ref,
                         o_ref, *, n_tokens, embed_dim):
    N, E = n_tokens, embed_dim

    # ---- PatchEmbedding: (N, K) @ (K, E) + b  (bf16 MXU, f32 accumulate) ----
    emb = jnp.dot(x_ref[0], wpe_ref[...],
                  preferred_element_type=jnp.float32) + bpe_ref[...]

    # ---- SpectralDependencyModule ------------------------------------------
    # Single fused QKV matmul; the 1/sqrt(N) scale is pre-folded into Q's block.
    qkv = jnp.dot(emb.astype(jnp.bfloat16), wqkv_ref[...],
                  preferred_element_type=jnp.float32)            # (N, 3E) f32
    q = qkv[:, :E].astype(jnp.bfloat16)
    k = qkv[:, E:2 * E].astype(jnp.bfloat16)
    v = qkv[:, 2 * E:].astype(jnp.bfloat16)

    # scores = (scaled Q) @ K^T as an "NT" dot_general (no explicit transpose).
    s = jax.lax.dot_general(q, k, (((1,), (1,)), ((), ())),
                            preferred_element_type=jnp.float32)  # (N, N) f32
    s = s - jnp.max(s, axis=-1, keepdims=True)
    e = jnp.exp(s)
    inv_l = pl.reciprocal(jnp.sum(e, axis=-1, keepdims=True), approx=True)
    attn = (e * inv_l).astype(jnp.bfloat16)
    out_tok = jnp.dot(attn, v, preferred_element_type=jnp.float32)  # (N, E) f32

    # TODO(synk): SwinTransformerStage source not provided -> treated as identity.

    # ---- .view(B,E,Hp,Wp) + AdaptiveAvgPool2d(1) + flatten + fc -------------
    # The reference's raw view mixes token/channel indices; pooled[c] is the
    # mean of the c-th length-N chunk of the row-major-flattened (N, E) tile.
    # That whole head is folded into wpf[n, e, c] = fc_w[c, (n*E + e)//N] / N:
    #   logits = sum_n out_tok[n, :] @ wpf[n]  +  fc_b
    # (N tiny M=1 dots; negligible here.  At scaled-up shapes replace with a
    #  single flat (1, N*E) @ (N*E, classes) matmul.)
    acc = fcb_ref[...]                                           # (1, C) f32
    for n in range(N):
        acc = acc + jnp.dot(out_tok[n:n + 1, :], wpf_ref[n],
                            preferred_element_type=jnp.float32)
    o_ref[0] = acc


# ----------------------------------------------------------------------------
# Parameter init (PyTorch layouts) and one-time packing into kernel layouts
# ----------------------------------------------------------------------------
def init_params(key, in_channels, embed_dim, num_classes, patch_size):
    ks = jax.random.split(key, 6)
    return {
        # Conv2d(in_channels, embed_dim, kernel=patch, stride=patch)
        "patch_w": 0.02 * jax.random.normal(
            ks[0], (embed_dim, in_channels, patch_size, patch_size), jnp.float32),
        "patch_b": 0.01 * jax.random.normal(ks[1], (embed_dim,), jnp.float32),
        # SDM: three bias-free Linear(embed_dim, embed_dim), PyTorch (out, in)
        "wq": 0.02 * jax.random.normal(ks[2], (embed_dim, embed_dim), jnp.float32),
        "wk": 0.02 * jax.random.normal(ks[3], (embed_dim, embed_dim), jnp.float32),
        "wv": 0.02 * jax.random.normal(ks[4], (embed_dim, embed_dim), jnp.float32),
        # fc: Linear(final_channels, num_classes); final_channels == embed_dim
        # because depths has length 2 (num_downscales == 0).
        "fc_w": 0.02 * jax.random.normal(ks[5], (num_classes, embed_dim), jnp.float32),
        "fc_b": jnp.zeros((num_classes,), jnp.float32),
    }


def pack_params(params, *, patch_size, input_resolution):
    """One-time packing of PyTorch-layout params into kernel-ready layouts."""
    H, W = input_resolution
    p = patch_size
    conv_w = params["patch_w"]                       # (E, Cin, p, p)
    E = conv_w.shape[0]
    K = conv_w.shape[1] * p * p
    N = (H // p) * (W // p)
    C = params["fc_w"].shape[0]
    scale = 1.0 / float(N) ** 0.5                    # K_t.shape[-1] == N in the ref

    # Non-overlapping conv == per-patch matmul with (K, E) weight.
    w_pe = conv_w.reshape(E, K).T.astype(jnp.bfloat16)
    b_pe = params["patch_b"].reshape(1, E).astype(jnp.float32)
    # nn.Linear does x @ W.T; pack [Wq.T * scale, Wk.T, Wv.T] -> (E, 3E) bf16.
    w_qkv = jnp.concatenate(
        [params["wq"].T * scale, params["wk"].T, params["wv"].T],
        axis=1).astype(jnp.bfloat16)
    # Fold raw-view + AdaptiveAvgPool2d(1) + fc: wpf[n, e, c] = fc_w[c, (nE+e)//N]/N.
    w_pf = (jnp.repeat(params["fc_w"].T, N, axis=0) / N).reshape(N, E, C)
    w_pf = w_pf.astype(jnp.float32)
    fc_b = params["fc_b"].reshape(1, C).astype(jnp.float32)
    return {"w_pe": w_pe, "b_pe": b_pe, "w_qkv": w_qkv, "w_pf": w_pf, "fc_b": fc_b}


# ----------------------------------------------------------------------------
# Forward wrapper (single fused pallas_call)
# ----------------------------------------------------------------------------
def chromaformer_forward(x, packed, patch_size):
    B, Cin, H, W = x.shape
    p = patch_size
    Hp, Wp = H // p, W // p
    N = Hp * Wp
    K = Cin * p * p
    E = packed["b_pe"].shape[1]
    C = packed["fc_b"].shape[1]
    assert packed["w_pf"].shape[0] == N, "packed params built for another resolution"

    # im2col for the kernel=stride=patch conv: (B, N, K) rows, bf16 for the MXU.
    patches = (
        x.reshape(B, Cin, Hp, p, Wp, p)
        .transpose(0, 2, 4, 1, 3, 5)
        .reshape(B, N, K)
        .astype(jnp.bfloat16)
    )

    kernel = functools.partial(_chromaformer_kernel, n_tokens=N, embed_dim=E)
    # NOTE: at scaled-up N/E the SDM part must be KV-tiled (flash-style, inner
    # "arbitrary" grid axis) and the patch-embed M-tiled to fit v7x's 64 MiB VMEM.
    out = pl.pallas_call(
        kernel,
        out_shape=jax.ShapeDtypeStruct((B, 1, C), jnp.float32),
        grid=(B,),
        in_specs=[
            pl.BlockSpec((1, N, K), lambda b: (b, 0, 0)),     # patch rows (bf16)
            pl.BlockSpec((K, E), lambda b: (0, 0)),           # patch-embed weight
            pl.BlockSpec((1, E), lambda b: (0, 0)),           # patch-embed bias
            pl.BlockSpec((E, 3 * E), lambda b: (0, 0)),       # packed QKV weight
            pl.BlockSpec((N, E, C), lambda b: (0, 0, 0)),     # pool+fc operator
            pl.BlockSpec((1, C), lambda b: (0, 0)),           # fc bias
        ],
        out_specs=pl.BlockSpec((1, 1, C), lambda b: (b, 0, 0)),
        compiler_params=pltpu.CompilerParams(dimension_semantics=("parallel",)),
    )(patches, packed["w_pe"], packed["b_pe"], packed["w_qkv"],
      packed["w_pf"], packed["fc_b"])

    return out.reshape(B, C)


# ----------------------------------------------------------------------------
if __name__ == "__main__":
    # Small config consistent with the module's forward:
    #   in_channels=4, embedding_channels=32, input_resolution=(16,16),
    #   patch_size=4, depths of length 2 -> final_channels=32, num_classes=10.
    B, Cin, H, W = 2, 4, 16, 16
    embedding_channels = 32
    patch_size = 4
    num_classes = 10

    root = jax.random.PRNGKey(0)
    k_params, k_x = jax.random.split(root)
    params = init_params(k_params, Cin, embedding_channels, num_classes, patch_size)
    packed = pack_params(params, patch_size=patch_size, input_resolution=(H, W))
    x = jax.random.normal(k_x, (B, Cin, H, W), jnp.float32)

    fwd = jax.jit(functools.partial(chromaformer_forward, patch_size=patch_size))
    out = fwd(x, packed)
    out = jax.block_until_ready(out)

    assert out.shape == (B, num_classes), out.shape
    assert out.dtype == jnp.float32
    print("KERNEL_OK")
</pallas_src>

<mosaic_0001>
module attributes {stable_mosaic.version = 11 : i64} {
  func.func @_chromaformer_kernel(%arg0: i32, %arg1: memref<1x16x64xbf16, #tpu.memory_space<vmem>>, %arg2: memref<64x32xbf16, #tpu.memory_space<vmem>>, %arg3: memref<1x32xf32, #tpu.memory_space<vmem>>, %arg4: memref<32x96xbf16, #tpu.memory_space<vmem>>, %arg5: memref<16x32x10xf32, #tpu.memory_space<vmem>>, %arg6: memref<1x10xf32, #tpu.memory_space<vmem>>, %arg7: memref<1x1x10xf32, #tpu.memory_space<vmem>>) attributes {dimension_semantics = [#tpu.dimension_semantics<parallel>], iteration_bounds = array<i64: 2>, scalar_prefetch = 0 : i64, scratch_operands = 0 : i64, tpu.core_type = #tpu.core_type<tc>, window_params = [{transform_indices = @transform_0, window_bounds = array<i64: 1, 16, 64>}, {pipeline_mode = #tpu.pipeline_mode<synchronous>, transform_indices = @transform_1, window_bounds = array<i64: 64, 32>}, {pipeline_mode = #tpu.pipeline_mode<synchronous>, transform_indices = @transform_2, window_bounds = array<i64: 1, 32>}, {pipeline_mode = #tpu.pipeline_mode<synchronous>, transform_indices = @transform_3, window_bounds = array<i64: 32, 96>}, {pipeline_mode = #tpu.pipeline_mode<synchronous>, transform_indices = @transform_4, window_bounds = array<i64: 16, 32, 10>}, {pipeline_mode = #tpu.pipeline_mode<synchronous>, transform_indices = @transform_5, window_bounds = array<i64: 1, 10>}, {transform_indices = @transform_6, window_bounds = array<i64: 1, 1, 10>}]} {
    %c0 = arith.constant 0 : index
    %c0_0 = arith.constant 0 : index
    %c0_1 = arith.constant 0 : index
    %0 = vector.load %arg1[%c0, %c0_0, %c0_1] : memref<1x16x64xbf16, #tpu.memory_space<vmem>>, vector<1x16x64xbf16>
    %1 = vector.shape_cast %0 : vector<1x16x64xbf16> to vector<16x64xbf16>
    %c0_2 = arith.constant 0 : index
    %c0_3 = arith.constant 0 : index
    %2 = vector.load %arg2[%c0_2, %c0_3] : memref<64x32xbf16, #tpu.memory_space<vmem>>, vector<64x32xbf16>
    %cst = arith.constant dense<0.000000e+00> : vector<16x32xf32>
    %3 = tpu.matmul %1, %2, %cst {dimension_numbers = #tpu.dot_dimension_numbers<[1], [0], [0], [1], [0, 0, 1, 1], [], []>} : vector<16x64xbf16>, vector<64x32xbf16>, vector<16x32xf32> -> vector<16x32xf32>
    %c0_4 = arith.constant 0 : index
    %c0_5 = arith.constant 0 : index
    %4 = vector.load %arg3[%c0_4, %c0_5] : memref<1x32xf32, #tpu.memory_space<vmem>>, vector<1x32xf32>
    %5 = vector.broadcast %4 : vector<1x32xf32> to vector<16x32xf32>
    %6 = arith.addf %3, %5 : vector<16x32xf32>
    %7 = arith.truncf %6 : vector<16x32xf32> to vector<16x32xbf16>
    %c0_6 = arith.constant 0 : index
    %c0_7 = arith.constant 0 : index
    %8 = vector.load %arg4[%c0_6, %c0_7] : memref<32x96xbf16, #tpu.memory_space<vmem>>, vector<32x96xbf16>
    %cst_8 = arith.constant dense<0.000000e+00> : vector<16x96xf32>
    %9 = tpu.matmul %7, %8, %cst_8 {dimension_numbers = #tpu.dot_dimension_numbers<[1], [0], [0], [1], [0, 0, 1, 1], [], []>} : vector<16x32xbf16>, vector<32x96xbf16>, vector<16x96xf32> -> vector<16x96xf32>
    %10 = vector.extract_strided_slice %9 {offsets = [0, 0], sizes = [16, 32], strides = [1, 1]} : vector<16x96xf32> to vector<16x32xf32>
    %11 = arith.truncf %10 : vector<16x32xf32> to vector<16x32xbf16>
    %12 = vector.extract_strided_slice %9 {offsets = [0, 32], sizes = [16, 32], strides = [1, 1]} : vector<16x96xf32> to vector<16x32xf32>
    %13 = arith.truncf %12 : vector<16x32xf32> to vector<16x32xbf16>
    %14 = vector.extract_strided_slice %9 {offsets = [0, 64], sizes = [16, 32], strides = [1, 1]} : vector<16x96xf32> to vector<16x32xf32>
    %15 = arith.truncf %14 : vector<16x32xf32> to vector<16x32xbf16>
    %cst_9 = arith.constant dense<0.000000e+00> : vector<16x16xf32>
    %16 = tpu.matmul %11, %13, %cst_9 {dimension_numbers = #tpu.dot_dimension_numbers<[1], [1], [0], [0], [0, 0, 1, 0], [], []>} : vector<16x32xbf16>, vector<16x32xbf16>, vector<16x16xf32> -> vector<16x16xf32>
    %cst_10 = arith.constant dense<0xFF800000> : vector<16xf32>
    %17 = vector.multi_reduction <maximumf>, %16, %cst_10 [1] : vector<16x16xf32> to vector<16xf32>
    %18 = vector.shape_cast %17 : vector<16xf32> to vector<16x1xf32>
    %19 = vector.broadcast %18 : vector<16x1xf32> to vector<16x16xf32>
    %20 = arith.subf %16, %19 : vector<16x16xf32>
    %21 = math.exp %20 : vector<16x16xf32>
    %cst_11 = arith.constant dense<0.000000e+00> : vector<16xf32>
    %22 = vector.multi_reduction <add>, %21, %cst_11 [1] : vector<16x16xf32> to vector<16xf32>
    %23 = vector.shape_cast %22 : vector<16xf32> to vector<16x1xf32>
    %24 = tpu.reciprocal %23 {approx = true} : vector<16x1xf32> -> vector<16x1xf32>
    %25 = vector.broadcast %24 : vector<16x1xf32> to vector<16x16xf32>
    %26 = arith.mulf %21, %25 : vector<16x16xf32>
    %27 = arith.truncf %26 : vector<16x16xf32> to vector<16x16xbf16>
    %cst_12 = arith.constant dense<0.000000e+00> : vector<16x32xf32>
    %28 = tpu.matmul %27, %15, %cst_12 {dimension_numbers = #tpu.dot_dimension_numbers<[1], [0], [0], [1], [0, 0, 1, 1], [], []>} : vector<16x16xbf16>, vector<16x32xbf16>, vector<16x32xf32> -> vector<16x32xf32>
    %c0_13 = arith.constant 0 : index
    %c0_14 = arith.constant 0 : index
    %29 = vector.load %arg6[%c0_13, %c0_14] : memref<1x10xf32, #tpu.memory_space<vmem>>, vector<1x10xf32>
    %30 = vector.extract_strided_slice %28 {offsets = [0, 0], sizes = [1, 32], strides = [1, 1]} : vector<16x32xf32> to vector<1x32xf32>
    %c0_15 = arith.constant 0 : index
    %c0_16 = arith.constant 0 : index
    %c0_17 = arith.constant 0 : index
    %31 = vector.load %arg5[%c0_15, %c0_16, %c0_17] : memref<16x32x10xf32, #tpu.memory_space<vmem>>, vector<1x32x10xf32>
    %32 = vector.shape_cast %31 : vector<1x32x10xf32> to vector<32x10xf32>
    %cst_18 = arith.constant dense<0.000000e+00> : vector<1x10xf32>
    %33 = tpu.matmul %30, %32, %cst_18 {dimension_numbers = #tpu.dot_dimension_numbers<[1], [0], [0], [1], [0, 0, 1, 1], [], []>} : vector<1x32xf32>, vector<32x10xf32>, vector<1x10xf32> -> vector<1x10xf32>
    %34 = arith.addf %29, %33 : vector<1x10xf32>
    %35 = vector.extract_strided_slice %28 {offsets = [1, 0], sizes = [1, 32], strides = [1, 1]} : vector<16x32xf32> to vector<1x32xf32>
    %c1 = arith.constant 1 : index
    %c0_19 = arith.constant 0 : index
    %c0_20 = arith.constant 0 : index
    %36 = vector.load %arg5[%c1, %c0_19, %c0_20] : memref<16x32x10xf32, #tpu.memory_space<vmem>>, vector<1x32x10xf32>
    %37 = vector.shape_cast %36 : vector<1x32x10xf32> to vector<32x10xf32>
    %cst_21 = arith.constant dense<0.000000e+00> : vector<1x10xf32>
    %38 = tpu.matmul %35, %37, %cst_21 {dimension_numbers = #tpu.dot_dimension_numbers<[1], [0], [0], [1], [0, 0, 1, 1], [], []>} : vector<1x32xf32>, vector<32x10xf32>, vector<1x10xf32> -> vector<1x10xf32>
    %39 = arith.addf %34, %38 : vector<1x10xf32>
    %40 = vector.extract_strided_slice %28 {offsets = [2, 0], sizes = [1, 32], strides = [1, 1]} : vector<16x32xf32> to vector<1x32xf32>
    %c2 = arith.constant 2 : index
    %c0_22 = arith.constant 0 : index
    %c0_23 = arith.constant 0 : index
    %41 = vector.load %arg5[%c2, %c0_22, %c0_23] : memref<16x32x10xf32, #tpu.memory_space<vmem>>, vector<1x32x10xf32>
    %42 = vector.shape_cast %41 : vector<1x32x10xf32> to vector<32x10xf32>
    %cst_24 = arith.constant dense<0.000000e+00> : vector<1x10xf32>
    %43 = tpu.matmul %40, %42, %cst_24 {dimension_numbers = #tpu.dot_dimension_numbers<[1], [0], [0], [1], [0, 0, 1, 1], [], []>} : vector<1x32xf32>, vector<32x10xf32>, vector<1x10xf32> -> vector<1x10xf32>
    %44 = arith.addf %39, %43 : vector<1x10xf32>
    %45 = vector.extract_strided_slice %28 {offsets = [3, 0], sizes = [1, 32], strides = [1, 1]} : vector<16x32xf32> to vector<1x32xf32>
    %c3 = arith.constant 3 : index
    %c0_25 = arith.constant 0 : index
    %c0_26 = arith.constant 0 : index
    %46 = vector.load %arg5[%c3, %c0_25, %c0_26] : memref<16x32x10xf32, #tpu.memory_space<vmem>>, vector<1x32x10xf32>
    %47 = vector.shape_cast %46 : vector<1x32x10xf32> to vector<32x10xf32>
    %cst_27 = arith.constant dense<0.000000e+00> : vector<1x10xf32>
    %48 = tpu.matmul %45, %47, %cst_27 {dimension_numbers = #tpu.dot_dimension_numbers<[1], [0], [0], [1], [0, 0, 1, 1], [], []>} : vector<1x32xf32>, vector<32x10xf32>, vector<1x10xf32> -> vector<1x10xf32>
    %49 = arith.addf %44, %48 : vector<1x10xf32>
    %50 = vector.extract_strided_slice %28 {offsets = [4, 0], sizes = [1, 32], strides = [1, 1]} : vector<16x32xf32> to vector<1x32xf32>
    %c4 = arith.constant 4 : index
    %c0_28 = arith.constant 0 : index
    %c0_29 = arith.constant 0 : index
    %51 = vector.load %arg5[%c4, %c0_28, %c0_29] : memref<16x32x10xf32, #tpu.memory_space<vmem>>, vector<1x32x10xf32>
    %52 = vector.shape_cast %51 : vector<1x32x10xf32> to vector<32x10xf32>
    %cst_30 = arith.constant dense<0.000000e+00> : vector<1x10xf32>
    %53 = tpu.matmul %50, %52, %cst_30 {dimension_numbers = #tpu.dot_dimension_numbers<[1], [0], [0], [1], [0, 0, 1, 1], [], []>} : vector<1x32xf32>, vector<32x10xf32>, vector<1x10xf32> -> vector<1x10xf32>
    %54 = arith.addf %49, %53 : vector<1x10xf32>
    %55 = vector.extract_strided_slice %28 {offsets = [5, 0], sizes = [1, 32], strides = [1, 1]} : vector<16x32xf32> to vector<1x32xf32>
    %c5 = arith.constant 5 : index
    %c0_31 = arith.constant 0 : index
    %c0_32 = arith.constant 0 : index
    %56 = vector.load %arg5[%c5, %c0_31, %c0_32] : memref<16x32x10xf32, #tpu.memory_space<vmem>>, vector<1x32x10xf32>
    %57 = vector.shape_cast %56 : vector<1x32x10xf32> to vector<32x10xf32>
    %cst_33 = arith.constant dense<0.000000e+00> : vector<1x10xf32>
    %58 = tpu.matmul %55, %57, %cst_33 {dimension_numbers = #tpu.dot_dimension_numbers<[1], [0], [0], [1], [0, 0, 1, 1], [], []>} : vector<1x32xf32>, vector<32x10xf32>, vector<1x10xf32> -> vector<1x10xf32>
    %59 = arith.addf %54, %58 : vector<1x10xf32>
    %60 = vector.extract_strided_slice %28 {offsets = [6, 0], sizes = [1, 32], strides = [1, 1]} : vector<16x32xf32> to vector<1x32xf32>
    %c6 = arith.constant 6 : index
    %c0_34 = arith.constant 0 : index
    %c0_35 = arith.constant 0 : index
    %61 = vector.load %arg5[%c6, %c0_34, %c0_35] : memref<16x32x10xf32, #tpu.memory_space<vmem>>, vector<1x32x10xf32>
    %62 = vector.shape_cast %61 : vector<1x32x10xf32> to vector<32x10xf32>
    %cst_36 = arith.constant dense<0.000000e+00> : vector<1x10xf32>
    %63 = tpu.matmul %60, %62, %cst_36 {dimension_numbers = #tpu.dot_dimension_numbers<[1], [0], [0], [1], [0, 0, 1, 1], [], []>} : vector<1x32xf32>, vector<32x10xf32>, vector<1x10xf32> -> vector<1x10xf32>
    %64 = arith.addf %59, %63 : vector<1x10xf32>
    %65 = vector.extract_strided_slice %28 {offsets = [7, 0], sizes = [1, 32], strides = [1, 1]} : vector<16x32xf32> to vector<1x32xf32>
    %c7 = arith.constant 7 : index
    %c0_37 = arith.constant 0 : index
    %c0_38 = arith.constant 0 : index
    %66 = vector.load %arg5[%c7, %c0_37, %c0_38] : memref<16x32x10xf32, #tpu.memory_space<vmem>>, vector<1x32x10xf32>
    %67 = vector.shape_cast %66 : vector<1x32x10xf32> to vector<32x10xf32>
    %cst_39 = arith.constant dense<0.000000e+00> : vector<1x10xf32>
    %68 = tpu.matmul %65, %67, %cst_39 {dimension_numbers = #tpu.dot_dimension_numbers<[1], [0], [0], [1], [0, 0, 1, 1], [], []>} : vector<1x32xf32>, vector<32x10xf32>, vector<1x10xf32> -> vector<1x10xf32>
    %69 = arith.addf %64, %68 : vector<1x10xf32>
    %70 = vector.extract_strided_slice %28 {offsets = [8, 0], sizes = [1, 32], strides = [1, 1]} : vector<16x32xf32> to vector<1x32xf32>
    %c8 = arith.constant 8 : index
    %c0_40 = arith.constant 0 : index
    %c0_41 = arith.constant 0 : index
    %71 = vector.load %arg5[%c8, %c0_40, %c0_41] : memref<16x32x10xf32, #tpu.memory_space<vmem>>, vector<1x32x10xf32>
    %72 = vector.shape_cast %71 : vector<1x32x10xf32> to vector<32x10xf32>
    %cst_42 = arith.constant dense<0.000000e+00> : vector<1x10xf32>
    %73 = tpu.matmul %70, %72, %cst_42 {dimension_numbers = #tpu.dot_dimension_numbers<[1], [0], [0], [1], [0, 0, 1, 1], [], []>} : vector<1x32xf32>, vector<32x10xf32>, vector<1x10xf32> -> vector<1x10xf32>
    %74 = arith.addf %69, %73 : vector<1x10xf32>
    %75 = vector.extract_strided_slice %28 {offsets = [9, 0], sizes = [1, 32], strides = [1, 1]} : vector<16x32xf32> to vector<1x32xf32>
    %c9 = arith.constant 9 : index
    %c0_43 = arith.constant 0 : index
    %c0_44 = arith.constant 0 : index
    %76 = vector.load %arg5[%c9, %c0_43, %c0_44] : memref<16x32x10xf32, #tpu.memory_space<vmem>>, vector<1x32x10xf32>
    %77 = vector.shape_cast %76 : vector<1x32x10xf32> to vector<32x10xf32>
    %cst_45 = arith.constant dense<0.000000e+00> : vector<1x10xf32>
    %78 = tpu.matmul %75, %77, %cst_45 {dimension_numbers = #tpu.dot_dimension_numbers<[1], [0], [0], [1], [0, 0, 1, 1], [], []>} : vector<1x32xf32>, vector<32x10xf32>, vector<1x10xf32> -> vector<1x10xf32>
    %79 = arith.addf %74, %78 : vector<1x10xf32>
    %80 = vector.extract_strided_slice %28 {offsets = [10, 0], sizes = [1, 32], strides = [1, 1]} : vector<16x32xf32> to vector<1x32xf32>
    %c10 = arith.constant 10 : index
    %c0_46 = arith.constant 0 : index
    %c0_47 = arith.constant 0 : index
    %81 = vector.load %arg5[%c10, %c0_46, %c0_47] : memref<16x32x10xf32, #tpu.memory_space<vmem>>, vector<1x32x10xf32>
    %82 = vector.shape_cast %81 : vector<1x32x10xf32> to vector<32x10xf32>
    %cst_48 = arith.constant dense<0.000000e+00> : vector<1x10xf32>
    %83 = tpu.matmul %80, %82, %cst_48 {dimension_numbers = #tpu.dot_dimension_numbers<[1], [0], [0], [1], [0, 0, 1, 1], [], []>} : vector<1x32xf32>, vector<32x10xf32>, vector<1x10xf32> -> vector<1x10xf32>
    %84 = arith.addf %79, %83 : vector<1x10xf32>
    %85 = vector.extract_strided_slice %28 {offsets = [11, 0], sizes = [1, 32], strides = [1, 1]} : vector<16x32xf32> to vector<1x32xf32>
    %c11 = arith.constant 11 : index
    %c0_49 = arith.constant 0 : index
    %c0_50 = arith.constant 0 : index
    %86 = vector.load %arg5[%c11, %c0_49, %c0_50] : memref<16x32x10xf32, #tpu.memory_space<vmem>>, vector<1x32x10xf32>
    %87 = vector.shape_cast %86 : vector<1x32x10xf32> to vector<32x10xf32>
    %cst_51 = arith.constant dense<0.000000e+00> : vector<1x10xf32>
    %88 = tpu.matmul %85, %87, %cst_51 {dimension_numbers = #tpu.dot_dimension_numbers<[1], [0], [0], [1], [0, 0, 1, 1], [], []>} : vector<1x32xf32>, vector<32x10xf32>, vector<1x10xf32> -> vector<1x10xf32>
    %89 = arith.addf %84, %88 : vector<1x10xf32>
    %90 = vector.extract_strided_slice %28 {offsets = [12, 0], sizes = [1, 32], strides = [1, 1]} : vector<16x32xf32> to vector<1x32xf32>
    %c12 = arith.constant 12 : index
    %c0_52 = arith.constant 0 : index
    %c0_53 = arith.constant 0 : index
    %91 = vector.load %arg5[%c12, %c0_52, %c0_53] : memref<16x32x10xf32, #tpu.memory_space<vmem>>, vector<1x32x10xf32>
    %92 = vector.shape_cast %91 : vector<1x32x10xf32> to vector<32x10xf32>
    %cst_54 = arith.constant dense<0.000000e+00> : vector<1x10xf32>
    %93 = tpu.matmul %90, %92, %cst_54 {dimension_numbers = #tpu.dot_dimension_numbers<[1], [0], [0], [1], [0, 0, 1, 1], [], []>} : vector<1x32xf32>, vector<32x10xf32>, vector<1x10xf32> -> vector<1x10xf32>
    %94 = arith.addf %89, %93 : vector<1x10xf32>
    %95 = vector.extract_strided_slice %28 {offsets = [13, 0], sizes = [1, 32], strides = [1, 1]} : vector<16x32xf32> to vector<1x32xf32>
    %c13 = arith.constant 13 : index
    %c0_55 = arith.constant 0 : index
    %c0_56 = arith.constant 0 : index
    %96 = vector.load %arg5[%c13, %c0_55, %c0_56] : memref<16x32x10xf32, #tpu.memory_space<vmem>>, vector<1x32x10xf32>
    %97 = vector.shape_cast %96 : vector<1x32x10xf32> to vector<32x10xf32>
    %cst_57 = arith.constant dense<0.000000e+00> : vector<1x10xf32>
    %98 = tpu.matmul %95, %97, %cst_57 {dimension_numbers = #tpu.dot_dimension_numbers<[1], [0], [0], [1], [0, 0, 1, 1], [], []>} : vector<1x32xf32>, vector<32x10xf32>, vector<1x10xf32> -> vector<1x10xf32>
    %99 = arith.addf %94, %98 : vector<1x10xf32>
    %100 = vector.extract_strided_slice %28 {offsets = [14, 0], sizes = [1, 32], strides = [1, 1]} : vector<16x32xf32> to vector<1x32xf32>
    %c14 = arith.constant 14 : index
    %c0_58 = arith.constant 0 : index
    %c0_59 = arith.constant 0 : index
    %101 = vector.load %arg5[%c14, %c0_58, %c0_59] : memref<16x32x10xf32, #tpu.memory_space<vmem>>, vector<1x32x10xf32>
    %102 = vector.shape_cast %101 : vector<1x32x10xf32> to vector<32x10xf32>
    %cst_60 = arith.constant dense<0.000000e+00> : vector<1x10xf32>
    %103 = tpu.matmul %100, %102, %cst_60 {dimension_numbers = #tpu.dot_dimension_numbers<[1], [0], [0], [1], [0, 0, 1, 1], [], []>} : vector<1x32xf32>, vector<32x10xf32>, vector<1x10xf32> -> vector<1x10xf32>
    %104 = arith.addf %99, %103 : vector<1x10xf32>
    %105 = vector.extract_strided_slice %28 {offsets = [15, 0], sizes = [1, 32], strides = [1, 1]} : vector<16x32xf32> to vector<1x32xf32>
    %c15 = arith.constant 15 : index
    %c0_61 = arith.constant 0 : index
    %c0_62 = arith.constant 0 : index
    %106 = vector.load %arg5[%c15, %c0_61, %c0_62] : memref<16x32x10xf32, #tpu.memory_space<vmem>>, vector<1x32x10xf32>
    %107 = vector.shape_cast %106 : vector<1x32x10xf32> to vector<32x10xf32>
    %cst_63 = arith.constant dense<0.000000e+00> : vector<1x10xf32>
    %108 = tpu.matmul %105, %107, %cst_63 {dimension_numbers = #tpu.dot_dimension_numbers<[1], [0], [0], [1], [0, 0, 1, 1], [], []>} : vector<1x32xf32>, vector<32x10xf32>, vector<1x10xf32> -> vector<1x10xf32>
    %109 = arith.addf %104, %108 : vector<1x10xf32>
    %c0_64 = arith.constant 0 : index
    %c0_65 = arith.constant 0 : index
    %c0_66 = arith.constant 0 : index
    %110 = vector.load %arg7[%c0_64, %c0_65, %c0_66] : memref<1x1x10xf32, #tpu.memory_space<vmem>>, vector<1x1x10xf32>
    %111 = vector.shape_cast %110 : vector<1x1x10xf32> to vector<1x10xf32>
    %112 = vector.shape_cast %109 : vector<1x10xf32> to vector<1x1x10xf32>
    tpu.vector_store %arg7[%c0_64, %c0_65, %c0_66], %112 {strides = array<i32>} : memref<1x1x10xf32, #tpu.memory_space<vmem>>, vector<1x1x10xf32>,
    return
  }
  func.func @transform_0(%arg0: i32) -> (i32, i32, i32) {
    %c0_i32 = arith.constant 0 : i32
    %c0_i32_0 = arith.constant 0 : i32
    %c0_i32_1 = arith.constant 0 : i32
    return %arg0, %c0_i32, %c0_i32_0 : i32, i32, i32
  }
  func.func @transform_1(%arg0: i32) -> (i32, i32) {
    %c0_i32 = arith.constant 0 : i32
    %c0_i32_0 = arith.constant 0 : i32
    %c0_i32_1 = arith.constant 0 : i32
    return %c0_i32, %c0_i32_0 : i32, i32
  }
  func.func @transform_2(%arg0: i32) -> (i32, i32) {
    %c0_i32 = arith.constant 0 : i32
    %c0_i32_0 = arith.constant 0 : i32
    %c0_i32_1 = arith.constant 0 : i32
    return %c0_i32, %c0_i32_0 : i32, i32
  }
  func.func @transform_3(%arg0: i32) -> (i32, i32) {
    %c0_i32 = arith.constant 0 : i32
    %c0_i32_0 = arith.constant 0 : i32
    %c0_i32_1 = arith.constant 0 : i32
    return %c0_i32, %c0_i32_0 : i32, i32
  }
  func.func @transform_4(%arg0: i32) -> (i32, i32, i32) {
    %c0_i32 = arith.constant 0 : i32
    %c0_i32_0 = arith.constant 0 : i32
    %c0_i32_1 = arith.constant 0 : i32
    %c0_i32_2 = arith.constant 0 : i32
    return %c0_i32, %c0_i32_0, %c0_i32_1 : i32, i32, i32
  }
  func.func @transform_5(%arg0: i32) -> (i32, i32) {
    %c0_i32 = arith.constant 0 : i32
    %c0_i32_0 = arith.constant 0 : i32
    %c0_i32_1 = arith.constant 0 : i32
    return %c0_i32, %c0_i32_0 : i32, i32
  }
  func.func @transform_6(%arg0: i32) -> (i32, i32, i32) {
    %c0_i32 = arith.constant 0 : i32
    %c0_i32_0 = arith.constant 0 : i32
    %c0_i32_1 = arith.constant 0 : i32
    return %arg0, %c0_i32, %c0_i32_0 : i32, i32, i32
  }
}

</mosaic_0001>

<bundles_post_ra>
// kernel: chromaformer_forward.1
= control target key start
LH: loop header
LB: loop body
LE: loop exit
PB: predicated region body
PF: predicated region fallthrough
CT: control target
= control target key end

     0   :  { %11 = vsyncpa [#allocation3], 0  ;;  %s1548_s0 = inlined_call_operand.vmem [shape: bf16[2,16,64], index: 0, kind: input, shape index: {}]   ;;  %s1549_s1 = inlined_call_operand.vmem [shape: bf16[64,32], index: 1, kind: input, shape index: {}]   ;;  %s1550_s2 = inlined_call_operand.vmem [shape: f32[1,32], index: 2, kind: input, shape index: {}]   ;;  %s1551_s3 = inlined_call_operand.vmem [shape: bf16[32,96], index: 3, kind: input, shape index: {}]   ;;  %s1552_s4 = inlined_call_operand.vmem [shape: f32[16,32,10], index: 4, kind: input, shape index: {}]   ;;  %s1553_s5 = inlined_call_operand.vmem [shape: f32[1,10], index: 5, kind: input, shape index: {}]   ;;  %s1554_s6 = inlined_call_operand.hbm [shape: f32[2,1,10], index: 6, kind: output, shape index: {}]  }
   0x1   :  { %13 = vsyncpa [#allocation3 + $0x1], 0  ;;  %s1223_s21 = smov 0   ;;  %s1225_s22 = smov 0  }
   0x2   :  { %s1227_s23 = smov 0   ;;  %s1229_s24 = smov 0  }
   0x3 LB: > { %s1244_s25 = sadd.s32 4294967295, %s1184_s24   ;;  %s948_s26 = sadd.s32 4294967294, %s1184_s24   ;;  %s1184_s24 = sphi %s1229_s24, %s1560_s24   ;;  %s1180_s23 = sphi %s1227_s23, %s1559_s23   ;;  %s1176_s22 = sphi %s1225_s22, %s1558_s22   ;;  %s1172_s21 = sphi %s1223_s21, %s1557_s21  }
   0x4   : > { %s1248_s27 = sadd.s32 1, %s1184_s24   ;;  %s157_s28 = sadd.s32 1, %s1180_s23 }
   0x5   : > { %s154_s29 = ssub.s32 %s1184_s24, %s1248_s27  ;;  %p167_p0 = scmp.ne.s32.totalorder %s1180_s23, %s1176_s22 }
   0x6   : > { %p155_p1 = scmp.eq.s32.totalorder %s154_s29, 0  ;;  %p168_p2 = scmp.eq.s32.totalorder %s1244_s25, 1 }
   0x7   : > { %p173_p3 = scmp.ne.s32.totalorder %s1176_s22, %s1172_s21  ;;  %p174_p4 = scmp.eq.s32.totalorder %s948_s26, 1 }
   0x8   : > { %s1259_s30 = scalar_select %p155_p1, %s1180_s23, %s157_s28  }
   0x9   : > { %p1261_p5 = por %p168_p2, %p167_p0  ;;  %p1265_p6 = por %p174_p4, %p173_p3 }
   0xa   : > { %p951_p7 = scmp.ge.s32.totalorder %s1184_s24, 1  ;;  %p215_p8 = scmp.lt.s32.totalorder %s1184_s24, 3 }
   0xc   : > { %p216_p9 = pnand %p951_p7, %p215_p8 }
   0xd   : > { %p244_p10 = scmp.lt.s32.totalorder (!%p216_p9), %s1244_s25, 1  ;;  %s1187_s14 = smov (!%p216_p9), 64  }
   0xe   : > { %219 = sbr.rel (%p216_p9) target bundleno = 1129 (0x469), region = 44  ;;  %s242_s10 = sand.u32 (!%p216_p9), 1, %s1176_s22  }
   0xf   : > { %s881_s17 = scalar_lea.sflag (!%p216_p9), [#allocation3], %s242_s10 }
  0x13   : > { %v1069_v0 = vld [vmem:[%s1549_s1 + $0x18] sm:$0xff]  ;;  %v1068_v1 = vld [vmem:[%s1549_s1 + $0x10] sm:$0xff]  ;;  %s245_s13 = scalar_select %p244_p10, %s1244_s25, 1  ;;  %v1067_v2 = vld [vmem:[%s1549_s1 + $0x8] sm:$0xff]  ;;  %vm293_vm0 = vcmask 523264   ;;  %vm328_vm1 = vcmask 261120  }
  0x14   : > { %301 = vmatpush.bf16.msra.mxu0 %v1069_v0  ;;  %v1066_v3 = vld [vmem:[%s1549_s1] sm:$0xff]  ;;  %v1071_v5 = vld [vmem:[%s1551_s3 + $0x8] sm:$0xff]  ;;  %vm370_vm2 = vcmask 130048   ;;  %v995_v32 = vld [vmem:[%s1552_s4 + $0x58] sm:$0xff]  ;;  %vm878_vm3 = vcmask 73728  }
  0x15   : > { %s1064_s16 = sshll.u32 %s245_s13, 3  ;;  %338 = vmatpush.bf16.msra.mxu1 %v1071_v5  ;;  %v1070_v6 = vld [vmem:[%s1551_s3] sm:$0xff]  ;;  %s1186_s13 = smov 96   ;;  %v990_v33 = vld [vmem:[%s1552_s4 + $0x38] sm:$0xff]  ;;  %v994_v34 = vld [vmem:[%s1552_s4 + $0x50] sm:$0xff] }
  0x16   : > { %s248_s26 = scalar_lea.vmem %s1548_s0, %s1064_s16  ;;  %v1113_v8 = vld [vmem:[%s1550_s2] ss:$0 sm:$0xff]  ;;  %v1005_v35 = vld [vmem:[%s1552_s4 + $0x98] sm:$0xff]  ;;  %v989_v36 = vld [vmem:[%s1552_s4 + $0x30] sm:$0xff] }
  0x17   : > { %v1065_v4 = vld [vmem:[%s248_s26] sm:$0xff]  ;;  %v1004_v37 = vld [vmem:[%s1552_s4 + $0x90] sm:$0xff]  ;;  %v993_v38 = vld [vmem:[%s1552_s4 + $0x48] sm:$0xff]  ;;  %s1142_s26 = scalar_lea.hbm %s1554_s6, 2 }
  0x18   : > { %302 = vmatpush.bf16.msra.mxu0 %v1068_v1  ;;  %v418_v43 = vld [vmem:[%s1552_s4 + $0x18] sm:$0xff]  ;;  %v417_v48 = vld [vmem:[%s1552_s4 + $0x10] sm:$0xff]  ;;  %v416_v49 = vld [vmem:[%s1552_s4 + $0x8] sm:$0xff] }
  0x19   : > { %339 = vmatpush.bf16.msra.mxu1 %v1070_v6  ;;  %v415_v50 = vld [vmem:[%s1552_s4] sm:$0xff]  ;;  %v988_v51 = vld [vmem:[%s1552_s4 + $0x28] sm:$0xff]  ;;  %v1000_v53 = vld [vmem:[%s1552_s4 + $0x78] sm:$0xff] }
  0x1a   : > { %v1003_v52 = vld [vmem:[%s1552_s4 + $0x88] sm:$0xff]  ;;  %v987_v54 = vld [vmem:[%s1552_s4 + $0x20] sm:$0xff]  ;;  %v999_v57 = vld [vmem:[%s1552_s4 + $0x70] sm:$0xff] }
  0x1b   : > { %v992_v55 = vld [vmem:[%s1552_s4 + $0x40] sm:$0xff]  ;;  %v1010_v58 = vld [vmem:[%s1552_s4 + $0xb8] sm:$0xff]  ;;  %v998_v61 = vld [vmem:[%s1552_s4 + $0x68] sm:$0xff] }
  0x1c   : > { %303 = vmatpush.bf16.msra.mxu0 %v1067_v2  ;;  %v1002_v56 = vld [vmem:[%s1552_s4 + $0x80] sm:$0xff]  ;;  %v1015_v59 = vld [vmem:[%s1552_s4 + $0xd8] sm:$0xff]  ;;  %v1009_v62 = vld [vmem:[%s1552_s4 + $0xb0] sm:$0xff] }
  0x1d   : > { %463 = vmatpush.msrb.mxu1 %v990_v33  ;;  %v1025_v60 = vld [vmem:[%s1552_s4 + $0x118] sm:$0xff]  ;;  %v1014_v63 = vld [vmem:[%s1552_s4 + $0xd0] sm:$0xff]  ;;  %v997_v1 = vld [vmem:[%s1552_s4 + $0x60] sm:$0xff] }
  0x1e   : > { %v1024_v0 = vld [vmem:[%s1552_s4 + $0x110] sm:$0xff]  ;;  %v1008_v2 = vld [vmem:[%s1552_s4 + $0xa8] sm:$0xff]  ;;  %v1007_v5 = vld [vmem:[%s1552_s4 + $0xa0] sm:$0xff] }
  0x1f   : > { %464 = vmatpush.msrb.mxu1 %v989_v36  ;;  %v1012_v6 = vld [vmem:[%s1552_s4 + $0xc0] sm:$0xff]  ;;  %v1039_v33 = vld [vmem:[%s1552_s4 + $0x170] sm:$0xff]  ;;  %v1038_v36 = vld [vmem:[%s1552_s4 + $0x168] sm:$0xff] }
  0x20   : > { %304 = vmatpush.bf16.msra.mxu0 %v1066_v3  ;;  %v1013_v3 = vld [vmem:[%s1552_s4 + $0xc8] sm:$0xff] }
  0x21   : > { %465 = vmatpush.msrb.mxu1 %v988_v51  ;;  %v1058_v51 = vld [vmem:[%s1552_s4 + $0x1e8] sm:$0xff] }
  0x23   : > { %974 = vmatmul.msk.bf16.vlgmr.msra.gmra.mxu0 %vm293_vm0, %v1065_v4  ;;  %466 = vmatpush.msrb.mxu1 %v987_v54  ;;  %v1023_v4 = vld [vmem:[%s1552_s4 + $0x108] sm:$0xff]  ;;  %v1057_v54 = vld [vmem:[%s1552_s4 + $0x1e0] sm:$0xff] }
  0x24   : > { %550 = vmatpush.msrb.mxu0 %v1005_v35  ;;  %v1055_v35 = vld [vmem:[%s1552_s4 + $0x1d8] sm:$0xff] }
  0x26   : > { %551 = vmatpush.msrb.mxu0 %v1004_v37  ;;  %v1049_v37 = vld [vmem:[%s1552_s4 + $0x1b0] sm:$0xff] }
  0x28   : > { %552 = vmatpush.msrb.mxu0 %v1003_v52 }
  0x2a   : > { %553 = vmatpush.msrb.mxu0 %v1002_v56 }
  0x2c   : > { %666 = vmatpush.msra.mxu0 %v1025_v60 }
  0x2e   : > { %667 = vmatpush.msra.mxu0 %v1024_v0 }
  0x30   : > { %668 = vmatpush.msra.mxu0 %v1023_v4 }
  0xa0   : > { %v306_v7 = vpop.f32.mrf.mxu0 }
  0xa1   : > { %v307_v10 = vadd.f32 %v1113_v8, %v306_v7  ;;  %v1022_v7 = vld [vmem:[%s1552_s4 + $0x100] sm:$0xff] }
  0xa2   : > { %669 = vmatpush.msra.mxu0 %v1022_v7 }
  0xa8   : > { %v308_v9 = vpop.f32.mrf.mxu0 }
  0xa9   : > { %v309_v11 = vadd.f32 %v1113_v8, %v308_v9  ;;  %v1020_v8 = vld [vmem:[%s1552_s4 + $0xf8] sm:$0xff] }
  0xab   : > { %v311_v12 = vpack.c.bf16 %v309_v11, %v307_v10 }
  0xad   : > { %983 = vmatmul.msk.bf16.vlgmr.msra.gmra.mxu1 %vm328_vm1, %v311_v12 }
  0xae   : > { %579 = vmatpush.msra.mxu1 %v1010_v58 }
  0xb0   : > { %580 = vmatpush.msra.mxu1 %v1009_v62 }
  0xb2   : > { %581 = vmatpush.msra.mxu1 %v1008_v2 }
  0xb4   : > { %582 = vmatpush.msra.mxu1 %v1007_v5 }
 0x12a   : > { %v341_v13 = vpop.f32.mrf.mxu1 }
 0x132   : > { %v343_v14 = vpop.f32.mrf.mxu1 }
 0x133   : > { %v346_v15 = vpack.c.bf16 %v343_v14, %v341_v13  ;;  %v1019_v13 = vld [vmem:[%s1552_s4 + $0xf0] sm:$0xff]  ;;  %v1030_v14 = vld [vmem:[%s1552_s4 + $0x138] sm:$0xff] }
 0x135   : > { %348 = vrot.lane.b32.xlu0 %v346_v15, %s1186_s13  ;;  %s889_s13 = scalar_lea.hbm %s1554_s6, %s1244_s25 }
 0x136   : > { %s893_s16 = sshll.u32 %s889_s13, 4  ;;  %s894_s16 = int_to_ptr.hbm [resolvable:$true] %s893_s16 }
 0x137   : > { %s1136_s18 = sshra.s32 %s894_s16, 4  ;;  %s1137_s18 = int_to_ptr.hbm [resolvable:$true] %s1136_s18 }
 0x138   : > { %s1138_s19 = scalar_lea.hbm %s1137_s18, 1  ;;  %p1143_p0 = scmp.lt.s32.totalorder %s1137_s18, %s1554_s6 }
 0x139   : > { %p1139_p11 = scmp.ne.s32.totalorder %s1137_s18, %s1138_s19  ;;  %p1144_p1 = scmp.lt.s32.totalorder %s1142_s26, %s1138_s19 }
 0x13b   : > { %p1140_p12 = pnand %p1139_p11, %p1261_p5  ;;  %p1145_p2 = por %p1144_p1, %p1143_p0 }
 0x13d   : > { %p1141_p13 = pneg %p1140_p12 }
 0x13f   : > { %p1146_p3 = pnand %p1145_p2, %p1141_p13 }
 0x1a7   : > { %v349_v16 = vpop.permute.xlu0 %348 }
 0x1a8   : > { %v354_v17 = vsel %vm328_vm1, %v349_v16, 0  ;;  %v1045_v16 = vld [vmem:[%s1552_s4 + $0x198] sm:$0xff] }
 0x1a9   : > { %363 = vmatpush.bf16.xpose.msra.mxu2 %v354_v17  ;;  %v1018_v17 = vld [vmem:[%s1552_s4 + $0xe8] sm:$0xff] }
 0x1b0   : > { %984 = vmatmul.msk.bf16.vlgmr.msra.gmra.mxu2 %vm328_vm1, %v346_v15 }
 0x1b1   : > { %492 = vmatpush.msrb.mxu2 %v995_v32  ;;  %v1042_v32 = vld [vmem:[%s1552_s4 + $0x180] sm:$0xff] }
 0x1b3   : > { %493 = vmatpush.msrb.mxu2 %v994_v34  ;;  %v1050_v34 = vld [vmem:[%s1552_s4 + $0x1b8] sm:$0xff] }
 0x1b5   : > { %494 = vmatpush.msrb.mxu2 %v993_v38 }
 0x1b7   : > { %495 = vmatpush.msrb.mxu2 %v992_v55 }
 0x1b9   : > { %608 = vmatpush.msra.mxu2 %v1015_v59 }
 0x1bb   : > { %609 = vmatpush.msra.mxu2 %v1014_v63 }
 0x1bd   : > { %610 = vmatpush.msra.mxu2 %v1013_v3 }
 0x1bf   : > { %611 = vmatpush.msra.mxu2 %v1012_v6 }
 0x233   : > { %v365_v18 = vpop.f32.mrf.mxu2 }
 0x234   : > { %v371_v19 = vsel %vm370_vm2, %v365_v18, -inf }
 0x235   : > { %372 = vmax.xlane.f32.xlu0 %v371_v19  ;;  %v1034_v19 = vld [vmem:[%s1552_s4 + $0x150] sm:$0xff] }
 0x23b   : > { %v367_v20 = vpop.f32.mrf.mxu2 }
 0x23c   : > { %v374_v21 = vsel %vm370_vm2, %v367_v20, -inf }
 0x23d   : > { %375 = vmax.xlane.f32.xlu1 %v374_v21  ;;  %v1017_v21 = vld [vmem:[%s1552_s4 + $0xe0] sm:$0xff] }
 0x2a8   : > { %v373_v22 = vpop.xlane.xlu0 %372 }
 0x2a9   : > { %v377_v23 = vsub.f32 %v365_v18, %v373_v22  ;;  %v1029_v18 = vld [vmem:[%s1552_s4 + $0x130] sm:$0xff]  ;;  %v1028_v22 = vld [vmem:[%s1552_s4 + $0x128] sm:$0xff] }
 0x2ab   : > { %v379_v24 = vmul.f32 1.442695, %v377_v23 }
 0x2ad   : > { %1114 = vpow2.f32 %v379_v24  ;;  %v1033_v24 = vld [vmem:[%s1552_s4 + $0x148] sm:$0xff] }
 0x2b0   : > { %v376_v25 = vpop.xlane.xlu1 %375 }
 0x2b1   : > { %v378_v26 = vsub.f32 %v367_v20, %v376_v25  ;;  %v1044_v20 = vld [vmem:[%s1552_s4 + $0x190] sm:$0xff]  ;;  %v1043_v25 = vld [vmem:[%s1552_s4 + $0x188] sm:$0xff] }
 0x2b3   : > { %v1115_v27 = vpop.eup %1114  ;;  %v381_v28 = vmul.f32 1.442695, %v378_v26 }
 0x2b4   : > { %v383_v29 = vsel %vm370_vm2, %v1115_v27, 0.0 }
 0x2b5   : > { %1116 = vpow2.f32 %v381_v28  ;;  %384 = vadd.xlane.f32.xlu1 %v383_v29  ;;  %v1040_v28 = vld [vmem:[%s1552_s4 + $0x178] sm:$0xff]  ;;  %v1027_v29 = vld [vmem:[%s1552_s4 + $0x120] sm:$0xff] }
 0x2bb   : > { %v1117_v30 = vpop.eup %1116 }
 0x2bc   : > { %v386_v31 = vsel %vm370_vm2, %v1117_v30, 0.0 }
 0x2bd   : > { %387 = vadd.xlane.f32.xlu2 %v386_v31 }
 0x2d5   : > { %394 = vrot.lane.b32.xlu2 %v346_v15, %s1187_s14  ;;  %v1035_v15 = vld [vmem:[%s1552_s4 + $0x158] sm:$0xff]  ;;  %s243_s14 = scalar_lea.vmem [#allocation2], %s242_s10 }
 0x2d6   : > { %s891_s15 = sshll.u32 %s243_s14, 4  ;;  %s892_s15 = int_to_ptr.vmem [resolvable:$true] %s891_s15 }
 0x328   : > { %v385_v39 = vpop.xlane.xlu1 %384 }
 0x329   : > { %1118 = vrcp.f32 %v385_v39  ;;  %v1054_v39 = vld [vmem:[%s1552_s4 + $0x1d0] sm:$0xff] }
 0x32f   : > { %v1119_v41 = vpop.eup %1118 }
 0x330   : > { %v388_v40 = vpop.xlane.xlu2 %387  ;;  %v391_v45 = vmul.f32 %v1119_v41, %v1115_v27 }
 0x331   : > { %1120 = vrcp.f32 %v388_v40  ;;  %v1037_v40 = vld [vmem:[%s1552_s4 + $0x160] sm:$0xff] }
 0x337   : > { %v1121_v42 = vpop.eup %1120 }
 0x338   : > { %v395_v44 = vpop.permute.xlu2 %394  ;;  %v392_v46 = vmul.f32 %v1121_v42, %v1117_v30  ;;  %v1032_v30 = vld [vmem:[%s1552_s4 + $0x140] sm:$0xff] }
 0x339   : > { %407 = vmatpush.bf16.msra.mxu3 %v395_v44 }
 0x33a   : > { %v393_v47 = vpack.c.bf16 %v392_v46, %v391_v45  ;;  %v1053_v45 = vld [vmem:[%s1552_s4 + $0x1c8] sm:$0xff]  ;;  %v1060_v46 = vld [vmem:[%s1552_s4 + $0x1f8] sm:$0xff] }
 0x33c   : > { %985 = vmatmul.msk.bf16.vlgmr.msra.gmra.mxu3 %vm370_vm2, %v393_v47  ;;  %v1047_v47 = vld [vmem:[%s1552_s4 + $0x1a0] sm:$0xff] }
 0x33d   : > { %434 = vmatpush.msrb.mxu3 %v418_v43  ;;  %v1048_v43 = vld [vmem:[%s1552_s4 + $0x1a8] sm:$0xff] }
 0x33f   : > { %435 = vmatpush.msrb.mxu3 %v417_v48  ;;  %v1052_v48 = vld [vmem:[%s1552_s4 + $0x1c0] sm:$0xff] }
 0x341   : > { %436 = vmatpush.msrb.mxu3 %v416_v49  ;;  %v1059_v49 = vld [vmem:[%s1552_s4 + $0x1f0] sm:$0xff] }
 0x343   : > { %437 = vmatpush.msrb.mxu3 %v415_v50 }
 0x345   : > { %521 = vmatpush.msra.mxu3 %v1000_v53 }
 0x347   : > { %522 = vmatpush.msra.mxu3 %v999_v57  ;;  %v414_v57 = vld [vmem:[%s1553_s5] sm:$0x1] }
 0x349   : > { %523 = vmatpush.msra.mxu3 %v998_v61 }
 0x34b   : > { %524 = vmatpush.msra.mxu3 %v997_v1 }
 0x3bf   : > { %v409_v9 = vpop.f32.mrf.mxu3 }
 0x3c0   : > { %986 = vmatmul.msk.f32.vlgmr.msrb.gmra.mxu3 %vm328_vm1, %v409_v9  ;;  %v448_v10 = vrot.slane %v409_v9, 1  ;;  %v477_v11 = vrot.slane %v409_v9, 2  ;;  %v535_v12 = vrot.slane %v409_v9, 4  ;;  %v506_v23 = vrot.slane %v409_v9, 3 }
 0x3c1   : > { %637 = vmatpush.msrb.mxu3 %v1020_v8  ;;  %v564_v26 = vrot.slane %v409_v9, 5  ;;  %v593_v27 = vrot.slane %v409_v9, 6  ;;  %v622_v38 = vrot.slane %v409_v9, 7 }
 0x3c2   : > { %991 = vmatmul.msk.f32.vlgmr.msrb.gmra.mxu1 %vm328_vm1, %v448_v10  ;;  %996 = vmatmul.msk.f32.vlgmr.msrb.gmra.mxu2 %vm328_vm1, %v477_v11 }
 0x3c3   : > { %1006 = vmatmul.msk.f32.vlgmr.msrb.gmra.mxu0 %vm328_vm1, %v535_v12  ;;  %638 = vmatpush.msrb.mxu3 %v1019_v13 }
 0x3c4   : > { %695 = vmatpush.msrb.mxu1 %v1030_v14  ;;  %724 = vmatpush.msrb.mxu2 %v1035_v15 }
 0x3c5   : > { %782 = vmatpush.msrb.mxu0 %v1045_v16  ;;  %639 = vmatpush.msrb.mxu3 %v1018_v17 }
 0x3c6   : > { %696 = vmatpush.msrb.mxu1 %v1029_v18  ;;  %725 = vmatpush.msrb.mxu2 %v1034_v19 }
 0x3c7   : > { %783 = vmatpush.msrb.mxu0 %v1044_v20  ;;  %640 = vmatpush.msrb.mxu3 %v1017_v21  ;;  %v411_v31 = vpop.f32.mrf.mxu3 }
 0x3c8   : > { %1001 = vmatmul.msk.f32.vlgmr.msra.gmra.mxu3 %vm328_vm1, %v506_v23  ;;  %697 = vmatpush.msrb.mxu1 %v1028_v22  ;;  %v680_v41 = vrot.slane %v411_v31, 1  ;;  %v709_v42 = vrot.slane %v411_v31, 2  ;;  %v767_v44 = vrot.slane %v411_v31, 4  ;;  %v738_v50 = vrot.slane %v411_v31, 3 }
 0x3c9   : > { %726 = vmatpush.msrb.mxu2 %v1033_v24  ;;  %784 = vmatpush.msrb.mxu0 %v1043_v25  ;;  %v796_v52 = vrot.slane %v411_v31, 5  ;;  %v825_v53 = vrot.slane %v411_v31, 6  ;;  %v854_v55 = vrot.slane %v411_v31, 7 }
 0x3ca   : > { %1011 = vmatmul.msk.f32.vlgmr.msra.gmra.mxu1 %vm328_vm1, %v564_v26  ;;  %1016 = vmatmul.msk.f32.vlgmr.msra.gmra.mxu2 %vm328_vm1, %v593_v27 }
 0x3cb   : > { %1026 = vmatmul.msk.f32.vlgmr.msra.gmra.mxu0 %vm328_vm1, %v411_v31  ;;  %753 = vmatpush.msra.mxu3 %v1040_v28 }
 0x3cc   : > { %698 = vmatpush.msrb.mxu1 %v1027_v29  ;;  %727 = vmatpush.msrb.mxu2 %v1032_v30 }
 0x3cd   : > { %785 = vmatpush.msrb.mxu0 %v1042_v32  ;;  %754 = vmatpush.msra.mxu3 %v1039_v33 }
 0x3ce   : > { %811 = vmatpush.msra.mxu1 %v1050_v34  ;;  %840 = vmatpush.msra.mxu2 %v1055_v35 }
 0x3cf   : > { %755 = vmatpush.msra.mxu3 %v1038_v36 }
 0x3d0   : > { %1021 = vmatmul.msk.f32.vlgmr.msrb.gmra.mxu3 %vm328_vm1, %v622_v38  ;;  %812 = vmatpush.msra.mxu1 %v1049_v37 }
 0x3d1   : > { %841 = vmatpush.msra.mxu2 %v1054_v39  ;;  %756 = vmatpush.msra.mxu3 %v1037_v40 }
 0x3d2   : > { %1031 = vmatmul.msk.f32.vlgmr.msrb.gmra.mxu1 %vm328_vm1, %v680_v41  ;;  %1036 = vmatmul.msk.f32.vlgmr.msrb.gmra.mxu2 %vm328_vm1, %v709_v42 }
 0x3d3   : > { %1046 = vmatmul.msk.f32.vlgmr.msrb.gmra.mxu0 %vm328_vm1, %v767_v44  ;;  %813 = vmatpush.msra.mxu1 %v1048_v43 }
 0x3d4   : > { %842 = vmatpush.msra.mxu2 %v1053_v45  ;;  %869 = vmatpush.msrb.mxu3 %v1060_v46 }
 0x3d5   : > { %814 = vmatpush.msra.mxu1 %v1047_v47 }
 0x3d6   : > { %843 = vmatpush.msra.mxu2 %v1052_v48  ;;  %870 = vmatpush.msrb.mxu3 %v1059_v49 }
 0x3d8   : > { %1041 = vmatmul.msk.f32.vlgmr.msra.gmra.mxu3 %vm328_vm1, %v738_v50 }
 0x3d9   : > { %871 = vmatpush.msrb.mxu3 %v1058_v51 }
 0x3da   : > { %1051 = vmatmul.msk.f32.vlgmr.msra.gmra.mxu1 %vm328_vm1, %v796_v52  ;;  %1056 = vmatmul.msk.f32.vlgmr.msra.gmra.mxu2 %vm328_vm1, %v825_v53 }
 0x3db   : > { %872 = vmatpush.msrb.mxu3 %v1057_v54 }
 0x3e0   : > { %1061 = vmatmul.msk.f32.vlgmr.msrb.gmra.mxu3 %vm328_vm1, %v854_v55 }
 0x43f   : > { %v468_v56 = vpop.f32.mrf.mxu1 }
 0x440   : > { %v555_v62 = vpop.f32.mrf.mxu0 }
 0x443   : > { %v439_v58 = vpop.f32.mrf.mxu3 }
 0x444   : > { %v442_v59 = vadd.f32 %v439_v58, %v414_v57 }
 0x445   : > { %v497_v60 = vpop.f32.mrf.mxu2 }
 0x446   : > { %v471_v61 = vadd.f32 %v468_v56, %v442_v59 }
 0x447   : > { %v584_v0 = vpop.f32.mrf.mxu1 }
 0x448   : > { %v500_v63 = vadd.f32 %v497_v60, %v471_v61  ;;  %v671_v7 = vpop.f32.mrf.mxu0 }
 0x44b   : > { %v526_v1 = vpop.f32.mrf.mxu3 }
 0x44c   : > { %v529_v2 = vadd.f32 %v526_v1, %v500_v63 }
 0x44d   : > { %v613_v3 = vpop.f32.mrf.mxu2 }
 0x44e   : > { %v558_v4 = vadd.f32 %v555_v62, %v529_v2 }
 0x44f   : > { %v700_v10 = vpop.f32.mrf.mxu1 }
 0x450   : > { %v587_v5 = vadd.f32 %v584_v0, %v558_v4  ;;  %v787_v17 = vpop.f32.mrf.mxu0 }
 0x452   : > { %v616_v6 = vadd.f32 %v613_v3, %v587_v5 }
 0x453   : > { %v642_v8 = vpop.f32.mrf.mxu3 }
 0x454   : > { %v645_v9 = vadd.f32 %v642_v8, %v616_v6 }
 0x455   : > { %v729_v12 = vpop.f32.mrf.mxu2 }
 0x456   : > { %v674_v11 = vadd.f32 %v671_v7, %v645_v9 }
 0x457   : > { %v816_v19 = vpop.f32.mrf.mxu1 }
 0x458   : > { %v703_v13 = vadd.f32 %v700_v10, %v674_v11 }
 0x45a   : > { %v732_v14 = vadd.f32 %v729_v12, %v703_v13 }
 0x45b   : > { %v758_v15 = vpop.f32.mrf.mxu3 }
 0x45c   : > { %v761_v16 = vadd.f32 %v758_v15, %v732_v14 }
 0x45d   : > { %v845_v21 = vpop.f32.mrf.mxu2 }
 0x45e   : > { %v790_v18 = vadd.f32 %v787_v17, %v761_v16 }
 0x460   : > { %v819_v20 = vadd.f32 %v816_v19, %v790_v18 }
 0x462   : > { %v848_v22 = vadd.f32 %v845_v21, %v819_v20 }
 0x463   : > { %v874_v23 = vpop.f32.mrf.mxu3 }
 0x464   : > { %v877_v24 = vadd.f32 %v874_v23, %v848_v22 }
 0x466   : > { %879 = vst.msk [vmem:[%s243_s14] sm:$0x1] %vm878_vm3, %v877_v24 }
 0x467   : > { %1149 = shalt.err (!%p1146_p3)
}
 0x468   : > { %1072 = dma.vmem_to_hbm [thread:$0]  (%p1261_p5), %s892_s15, 16, %s894_s16, %s881_s17  }
 0x469 PF: > { %p1078_p4 = scmp.ge.s32.totalorder %s1184_s24, 2  ;;  %s905_s9 = sand.u32 1, %s1172_s21  }
 0x46a   : > { %s906_s10 = scalar_lea.sflag [#allocation3], %s905_s9 }
 0x46b   : > { %p1075_p7 = pnand %p1078_p4, %p1265_p6 }
 0x46d   : > { %p1076_p8 = pneg %p1075_p7 }
 0x46f   : > { %1167 = dma.done.wait (%p1076_p8), %s906_s10, 16  }
 0x470   : > { %1169 = vsyncadd (%p1076_p8), %s906_s10, 4294967280  ;;  %p16_p9 = scmp.ge.s32.totalorder %s1248_s27, 4   ;;  %s1557_s21 = smov %s1176_s22 }
 0x471   : > { %s1558_s22 = smov %s1180_s23  ;;  %s1559_s23 = smov %s1259_s30 }
 0x472   : > { %s1560_s24 = smov %s1248_s27  ;;  %18 = sbr.rel (!%p16_p9) target bundleno = 3 (0x3), region = 94 }
 0x477   :  { %911 = vsyncpa [#allocation3], 1 }
 0x478   :  { %913 = vsyncpa [#allocation3 + $0x1], 1 }

</bundles_post_ra>
